<compile_context>
chip_gen: v6e
topology: v6e:2x2x1
jax: 0.10.0
libtpu: 0.0.40
codegen_flags: <defaults>
</compile_context>

<pallas_src>
import jax
import jax.numpy as jnp
from jax import lax
from jax.experimental import pallas as pl
from jax.experimental.pallas import tpu as pltpu


def _round_up(v, m):
    return ((v + m - 1) // m) * m


def _vmem_capacity_bytes():
    """Per-core VMEM capacity; conservative 64 MiB (v7x) fallback."""
    try:
        info = pltpu.get_tpu_info()
        for attr in ("vmem_capacity_bytes", "vmem_bytes"):
            v = getattr(info, attr, None)
            if v:
                return int(v)
    except Exception:
        pass
    return 64 * 1024 * 1024


def _num_tensorcores():
    """TensorCores per chip; default 1 (v5e/v6e) if undetectable."""
    try:
        info = pltpu.get_tpu_info()
        for attr in ("num_cores", "core_count", "num_tensorcores",
                     "tensorcores_per_chip"):
            v = getattr(info, attr, None)
            if v:
                return int(v)
    except Exception:
        pass
    return 1


def _plan_tiling(F, tk_cap, n_cores):
    """Pick (tk, n_k) with n_k * tk >= F; tk is a 128-multiple unless tk == F."""
    if F <= tk_cap:
        # Single tile.  Optionally split in two for dual-TC chips (v7x).
        if n_cores >= 2 and F >= 32768 and F % 256 == 0:
            return F // 2, 2
        return F, 1
    if F % 128 == 0:
        # Prefer an exactly-dividing 128-multiple tile (no padding needed).
        tk = tk_cap - (tk_cap % 128)
        floor = max(8192, tk_cap // 4)
        while tk >= floor:
            if F % tk == 0:
                return tk, F // tk
            tk -= 128
    # Fallback: big fixed tile + zero-padded tail (F=128*prime, F%128!=0, ...).
    tk = max(128, tk_cap - (tk_cap % 128))
    return tk, pl.cdiv(F, tk)


def _linear_partial_kernel(x_ref, w_ref, o_ref):
    # x_ref: (B, TK), w_ref: (N, TK), o_ref: (B, N) f32 -- resident across the
    # K-reduction axis (same output block index for every k), so it doubles as
    # the accumulator; no separate VMEM scratch needed.
    @pl.when(pl.program_id(1) == 0)
    def _():
        o_ref[...] = jnp.zeros_like(o_ref)

    # Contract over F (axis 1 of both operands): (B, TK) x (N, TK) -> (B, N).
    o_ref[...] += lax.dot_general(
        x_ref[...], w_ref[...],
        dimension_numbers=(((1,), (1,)), ((), ())),
        preferred_element_type=jnp.float32)


def unet_classifier_tail(x, weight, bias):
    """x: (B, C, H, W); weight: (num_classes, F); bias: (num_classes,)."""
    B = int(x.shape[0])
    F = int(x.size // B)
    N = int(weight.shape[0])

    x_flat = x.reshape(B, F)          # glue: PyTorch x.view(B, -1), pure reshape

    # --- tile planning -------------------------------------------------------
    vmem_cap = _vmem_capacity_bytes()
    bpad = _round_up(B, 8)
    npad = _round_up(N, 8)
    # double-buffered f32 bytes (x tile + weight tile) per unit of TK
    per_tk_bytes = 2 * 4 * (bpad + npad)
    tk_cap = max(128, ((vmem_cap // 3) // per_tk_bytes) // 128 * 128)

    tk, n_k = _plan_tiling(F, tk_cap, _num_tensorcores())
    n_parts = 2 if (n_k >= 2 and n_k % 2 == 0) else 1
    kpp = n_k // n_parts              # K steps per part

    f_pad = n_k * tk
    if f_pad != F:
        # Rare path (F not a multiple of 128, or 128*prime-like): zero-pad the
        # contraction dim once; zeros do not change the dot product.
        # TODO(synk): in a real model, pad the weight once at init instead of
        # per call to avoid the one-time HBM copy here.
        x_flat = jnp.pad(x_flat, ((0, 0), (0, f_pad - F)))
        w = jnp.pad(weight, ((0, 0), (0, f_pad - F)))
    else:
        w = weight

    # --- VMEM budget ----------------------------------------------------------
    in_buf_bytes = per_tk_bytes * tk                       # double-buffered inputs
    out_buf_bytes = 2 * 4 * bpad * _round_up(N, 128)       # resident output slab
    vmem_limit = int(min(vmem_cap,
                         max(in_buf_bytes + out_buf_bytes + (8 << 20), 32 << 20)))

    partials = pl.pallas_call(
        _linear_partial_kernel,
        out_shape=jax.ShapeDtypeStruct((n_parts, B, N), jnp.float32),
        grid_spec=pltpu.PrefetchScalarGridSpec(
            num_scalar_prefetch=0,
            grid=(n_parts, kpp),
            in_specs=[
                # activations, F-tiled
                pl.BlockSpec((B, tk), lambda p, k: (0, p * kpp + k)),
                # weight, native (N, F) layout, F-tiled (lane-dense, long bursts)
                pl.BlockSpec((N, tk), lambda p, k: (0, p * kpp + k)),
            ],
            # one resident (B, N) f32 partial per part; p dim squeezed in-kernel
            out_specs=pl.BlockSpec((None, B, N), lambda p, k: (p, 0, 0)),
        ),
        compiler_params=pltpu.CompilerParams(
            dimension_semantics=("parallel", "arbitrary"),
            vmem_limit_bytes=vmem_limit),
        cost_estimate=pl.CostEstimate(
            flops=2 * B * N * F,
            transcendentals=0,
            bytes_accessed=4 * (B * F + N * F + B * N)),
    )(x_flat, w)

    # Combine the (at most 2) tiny partial slabs and add bias in f32.
    out = (jnp.sum(partials, axis=0) + bias.astype(jnp.float32)[None, :])
    return out.astype(x.dtype)


def init_params(key, num_classes, input_feature_dim, dtype=jnp.float32):
    # Deterministic init matching nn.Linear's default: U(-1/sqrt(F), 1/sqrt(F))
    kw, kb = jax.random.split(key)
    bound = 1.0 / jnp.sqrt(jnp.asarray(input_feature_dim, dtype=jnp.float32))
    weight = jax.random.uniform(
        kw, (num_classes, input_feature_dim), dtype, -bound, bound)
    bias = jax.random.uniform(kb, (num_classes,), dtype, -bound, bound)
    return weight, bias


if __name__ == "__main__":
    key = jax.random.PRNGKey(0)
    kx, kp = jax.random.split(key)

    B, C, H, W = 2, 4, 16, 16
    num_classes = 10
    input_feature_dim = C * H * W  # 1024

    x = jax.random.normal(kx, (B, C, H, W), dtype=jnp.float32)
    weight, bias = init_params(kp, num_classes, input_feature_dim)

    out = unet_classifier_tail(x, weight, bias)
    out = jax.block_until_ready(out)

    # Reference check in plain JAX
    ref = x.reshape(B, -1) @ weight.T + bias
    assert out.shape == (B, num_classes)
    assert jnp.allclose(out, ref, atol=1e-4, rtol=1e-4)

    print("KERNEL_OK")
</pallas_src>

<mosaic_0001>
module attributes {stable_mosaic.version = 11 : i64} {
  func.func @_linear_partial_kernel(%arg0: i32, %arg1: i32, %arg2: memref<2x1024xf32, #tpu.memory_space<vmem>>, %arg3: memref<10x1024xf32, #tpu.memory_space<vmem>>, %arg4: memref<1x2x10xf32, #tpu.memory_space<vmem>>) attributes {dimension_semantics = [#tpu.dimension_semantics<parallel>, #tpu.dimension_semantics<arbitrary>], iteration_bounds = array<i64: 1, 1>, scalar_prefetch = 0 : i64, scratch_operands = 0 : i64, tpu.core_type = #tpu.core_type<tc>, window_params = [{transform_indices = @transform_0, window_bounds = array<i64: 2, 1024>}, {transform_indices = @transform_1, window_bounds = array<i64: 10, 1024>}, {transform_indices = @transform_2, window_bounds = array<i64: 1, 2, 10>}]} {
    %c0_i32 = arith.constant 0 : i32
    %0 = arith.cmpi eq, %arg1, %c0_i32 : i32
    %1 = arith.extui %0 : i1 to i32
    %c0_i32_0 = arith.constant 0 : i32
    %2 = arith.cmpi ne, %1, %c0_i32_0 : i32
    scf.if %2 {
      %cst_10 = arith.constant 0.000000e+00 : f32
      %12 = vector.broadcast %cst_10 : f32 to vector<2x10xf32>
      %c0_11 = arith.constant 0 : index
      %c0_12 = arith.constant 0 : index
      %c0_13 = arith.constant 0 : index
      %13 = vector.load %arg4[%c0_11, %c0_12, %c0_13] : memref<1x2x10xf32, #tpu.memory_space<vmem>>, vector<1x2x10xf32>
      %14 = vector.shape_cast %13 : vector<1x2x10xf32> to vector<2x10xf32>
      %15 = vector.shape_cast %12 : vector<2x10xf32> to vector<1x2x10xf32>
      tpu.vector_store %arg4[%c0_11, %c0_12, %c0_13], %15 {strides = array<i32>} : memref<1x2x10xf32, #tpu.memory_space<vmem>>, vector<1x2x10xf32>,
    } else {
    }
    %c0 = arith.constant 0 : index
    %c0_1 = arith.constant 0 : index
    %c0_2 = arith.constant 0 : index
    %3 = vector.load %arg4[%c0, %c0_1, %c0_2] : memref<1x2x10xf32, #tpu.memory_space<vmem>>, vector<1x2x10xf32>
    %4 = vector.shape_cast %3 : vector<1x2x10xf32> to vector<2x10xf32>
    %c0_3 = arith.constant 0 : index
    %c0_4 = arith.constant 0 : index
    %5 = vector.load %arg2[%c0_3, %c0_4] : memref<2x1024xf32, #tpu.memory_space<vmem>>, vector<2x1024xf32>
    %c0_5 = arith.constant 0 : index
    %c0_6 = arith.constant 0 : index
    %6 = vector.load %arg3[%c0_5, %c0_6] : memref<10x1024xf32, #tpu.memory_space<vmem>>, vector<10x1024xf32>
    %cst = arith.constant dense<0.000000e+00> : vector<2x10xf32>
    %7 = tpu.matmul %5, %6, %cst {dimension_numbers = #tpu.dot_dimension_numbers<[1], [1], [0], [0], [0, 0, 1, 0], [], []>} : vector<2x1024xf32>, vector<10x1024xf32>, vector<2x10xf32> -> vector<2x10xf32>
    %8 = arith.addf %4, %7 : vector<2x10xf32>
    %c0_7 = arith.constant 0 : index
    %c0_8 = arith.constant 0 : index
    %c0_9 = arith.constant 0 : index
    %9 = vector.load %arg4[%c0_7, %c0_8, %c0_9] : memref<1x2x10xf32, #tpu.memory_space<vmem>>, vector<1x2x10xf32>
    %10 = vector.shape_cast %9 : vector<1x2x10xf32> to vector<2x10xf32>
    %11 = vector.shape_cast %8 : vector<2x10xf32> to vector<1x2x10xf32>
    tpu.vector_store %arg4[%c0_7, %c0_8, %c0_9], %11 {strides = array<i32>} : memref<1x2x10xf32, #tpu.memory_space<vmem>>, vector<1x2x10xf32>,
    return
  }
  func.func @transform_0(%arg0: i32, %arg1: i32) -> (i32, i32) {
    %c1_i32 = arith.constant 1 : i32
    %0 = arith.muli %arg0, %c1_i32 : i32
    %1 = arith.addi %0, %arg1 : i32
    %c0_i32 = arith.constant 0 : i32
    %c0_i32_0 = arith.constant 0 : i32
    return %c0_i32, %1 : i32, i32
  }
  func.func @transform_1(%arg0: i32, %arg1: i32) -> (i32, i32) {
    %c1_i32 = arith.constant 1 : i32
    %0 = arith.muli %arg0, %c1_i32 : i32
    %1 = arith.addi %0, %arg1 : i32
    %c0_i32 = arith.constant 0 : i32
    %c0_i32_0 = arith.constant 0 : i32
    return %c0_i32, %1 : i32, i32
  }
  func.func @transform_2(%arg0: i32, %arg1: i32) -> (i32, i32, i32) {
    %c0_i32 = arith.constant 0 : i32
    %c0_i32_0 = arith.constant 0 : i32
    %c0_i32_1 = arith.constant 0 : i32
    return %arg0, %c0_i32, %c0_i32_0 : i32, i32, i32
  }
}

</mosaic_0001>

<bundles_post_ra>
// kernel: tpu_custom_call.1
= control target key start
LH: loop header
LB: loop body
LE: loop exit
PB: predicated region body
PF: predicated region fallthrough
CT: control target
= control target key end

     0   :  { %7 = vsyncpa [#allocation3], 0  ;;  %s526_s0 = inlined_call_operand.hbm [shape: f32[2,1024], index: 0, kind: input, shape index: {}]   ;;  %s527_s1 = inlined_call_operand.hbm [shape: f32[10,1024], index: 1, kind: input, shape index: {}]   ;;  %s528_s2 = inlined_call_operand.hbm [shape: f32[1,2,10], index: 2, kind: output, shape index: {}]  }
   0x1   :  { %8 = vsyncpa [#allocation6], 0 }
   0x2   :  { %9 = vsyncpa [#allocation4], 0  ;;  %s493_s9 = smov [#allocation2]   ;;  %s494_s11 = smov [#allocation5]  }
   0x3   :  { %s20_s10 = sshll.u32 %s493_s9, 4  ;;  %s33_s12 = sshll.u32 %s494_s11, 4  ;;  %s21_s10 = int_to_ptr.vmem [resolvable:$true] %s20_s10  ;;  %s34_s12 = int_to_ptr.vmem [resolvable:$true] %s33_s12 }
   0x4   :  { %s435_s13 = scalar_lea.vmem %s21_s10, 256  ;;  %p440_p1 = scmp.lt.s32.totalorder %s21_s10, %s21_s10 }
   0x5   :  { %p436_p0 = scmp.ne.s32.totalorder %s21_s10, %s435_s13  ;;  %p441_p2 = scmp.lt.s32.totalorder %s435_s13, %s435_s13 }
   0x7   :  { %p442_p3 = por %p441_p2, %p440_p1 }
   0x9   :  { %p443_p4 = pnand %p442_p3, %p436_p0 }
   0xb   :  { %446 = shalt.err (!%p443_p4)
}
   0xc   :  { %23 = dma.hbm_to_vmem [thread:$0]  %s526_s0, 256, %s21_s10, [#allocation3]  }
   0xd   :  { %s455_s16 = scalar_lea.vmem %s34_s12, 2048  ;;  %p460_p6 = scmp.lt.s32.totalorder %s34_s12, %s34_s12 }
   0xe   :  { %p456_p5 = scmp.ne.s32.totalorder %s34_s12, %s455_s16  ;;  %p461_p7 = scmp.lt.s32.totalorder %s455_s16, %s455_s16 }
  0x10   :  { %p462_p8 = por %p461_p7, %p460_p6 }
  0x12   :  { %p463_p9 = pnand %p462_p8, %p456_p5 }
  0x14   :  { %466 = shalt.err (!%p463_p9)
}
  0x15   :  { %s495_s17 = smov 1024   ;;  %s496_s18 = smov 64  }
  0x16   :  { %39 = dma.hbm_to_vmem [thread:$0]  %s527_s1, 2048, %s34_s12, [#allocation6], %s495_s17, %s495_s17, %s496_s18  }
  0x17   :  { %487 = dma.done.wait [#allocation3], 256  }
  0x18   :  { %488 = vsyncadd [#allocation3], 4294967040 }
  0x19   :  { %489 = dma.done.wait [#allocation6], 2048  }
  0x1a   :  { %490 = vsyncadd [#allocation6], 4294965248  ;;  %v81_v0 = vlaneseq  ;;  %v497_v1 = vmov 1983009808   ;;  %v68_v6 = vld [vmem:[#allocation5 + $0x48] sm:$0x3] }
  0x1b   :  { %v79_v2 = vunpack.c.l.s4 %v497_v1  ;;  %v70_v7 = vld [vmem:[#allocation5 + $0x58] sm:$0x3]  ;;  %v67_v8 = vld [vmem:[#allocation5 + $0x40] sm:$0x3]  ;;  %147 = vmatprep.subr.mxu0 %v68_v6  ;;  %v69_v9 = vld [vmem:[#allocation5 + $0x50] sm:$0x3] }
  0x1c   :  { %v82_v3 = vshrl.u32 %v81_v0, 7  ;;  %217 = vmatprep.subr.mxu1 %v70_v7  ;;  %v60_v10 = vld [vmem:[#allocation5 + $0x8] sm:$0xff]  ;;  %v62_v11 = vld [vmem:[#allocation5 + $0x18] sm:$0xff]  ;;  %148 = vmatpush1.xpose.msra.mxu0 %v67_v8  ;;  %v57_v12 = vld [vmem:[#allocation2] sm:$0xff]  ;;  %vm54_vm0 = vcmask 74752   ;;  %v498_v34 = vmov 0.0  }
  0x1d   :  { %v80_v4 = vunpack.c.0.s8 %v79_v2  ;;  %218 = vmatpush1.xpose.msra.mxu1 %v69_v9  ;;  %149 = vmatprep.subr.mxu0 %v60_v10  ;;  %v59_v13 = vld [vmem:[#allocation5] sm:$0xff]  ;;  %v61_v14 = vld [vmem:[#allocation5 + $0x10] sm:$0xff]  ;;  %v77_v16 = vcombine.high %v57_v12, %v57_v12  ;;  %v72_v17 = vld [vmem:[#allocation5 + $0x68] sm:$0x3]  ;;  %55 = vst.msk [vmem:[#allocation7] sm:$0x3] %vm54_vm0, %v498_v34 }
  0x1e   :  { %219 = vmatprep.subr.mxu1 %v62_v11  ;;  %v74_v20 = vld [vmem:[#allocation5 + $0x78] sm:$0x3]  ;;  %v71_v25 = vld [vmem:[#allocation5 + $0x60] sm:$0x3]  ;;  %v73_v26 = vld [vmem:[#allocation5 + $0x70] sm:$0x3] }
  0x1f   :  { %v83_v5 = vsub.s32 %v80_v4, %v82_v3  ;;  %v58_v21 = vld [vmem:[#allocation2 + $0x8] sm:$0xff]  ;;  %v64_v27 = vld [vmem:[#allocation5 + $0x28] sm:$0xff]  ;;  %v63_v32 = vld [vmem:[#allocation5 + $0x20] sm:$0xff]  ;;  %s499_s0 = smov [#allocation7]  }
  0x20   :  { %150 = vmatpush1.xpose.msra.mxu0 %v59_v13  ;;  %v94_v23 = vcombine.high %v58_v21, %v58_v21  ;;  %v66_v30 = vld [vmem:[#allocation5 + $0x38] sm:$0xff]  ;;  %v65_v33 = vld [vmem:[#allocation5 + $0x30] sm:$0xff]  ;;  %s408_s1 = sshll.u32 %s499_s0, 4  ;;  %s409_s1 = int_to_ptr.vmem [resolvable:$true] %s408_s1 }
  0x21   :  { %v84_v15 = vrot.slane %v57_v12, %v83_v5  ;;  %v91_v19 = vrot.slane %v77_v16, %v83_v5  ;;  %220 = vmatpush1.xpose.msra.mxu1 %v61_v14  ;;  %v101_v22 = vrot.slane %v58_v21, %v83_v5  ;;  %287 = vmatprep.subr.mxu0 %v72_v17  ;;  %s467_s21 = scalar_lea.vmem %s409_s1, 32  ;;  %p472_p11 = scmp.lt.s32.totalorder %s409_s1, %s409_s1 }
  0x22   :  { %357 = vmatprep.subr.mxu1 %v74_v20  ;;  %v108_v29 = vrot.slane %v94_v23, %v83_v5  ;;  %p468_p10 = scmp.ne.s32.totalorder %s409_s1, %s467_s21  ;;  %p473_p12 = scmp.lt.s32.totalorder %s467_s21, %s467_s21 }
  0x23   :  { %v92_v18 = vcombine.high %v84_v15, %v84_v15  ;;  %v93_v24 = vcombine.high %v91_v19, %v91_v19  ;;  %v109_v28 = vcombine.high %v101_v22, %v101_v22 }
  0x24   :  { %v110_v31 = vcombine.high %v108_v29, %v108_v29  ;;  %v56_v43 = vld [vmem:[#allocation7] sm:$0x3]  ;;  %p474_p13 = por %p473_p12, %p472_p11 }
  0x25   :  { %183 = vmatprep.mubr.f32.mxu0 %v92_v18  ;;  %253 = vmatprep.mubr.f32.mxu1 %v93_v24 }
  0x26   :  { %184 = vmatmul.mubr.f32.vlgmr.msra.gmra.mxu0 %v84_v15  ;;  %254 = vmatmul.mubr.f32.vlgmr.msra.gmra.mxu1 %v91_v19  ;;  %p475_p0 = pnand %p474_p13, %p468_p10 }
  0x27   :  { %288 = vmatpush1.xpose.msra.mxu0 %v71_v25  ;;  %358 = vmatpush1.xpose.msra.mxu1 %v73_v26 }
  0x28   :  { %289 = vmatprep.subr.mxu0 %v64_v27  ;;  %359 = vmatprep.subr.mxu1 %v66_v30 }
  0x29   :  { %323 = vmatprep.mubr.f32.mxu0 %v109_v28  ;;  %393 = vmatprep.mubr.f32.mxu1 %v110_v31 }
  0x2b   :  { %290 = vmatpush1.xpose.msra.mxu0 %v63_v32  ;;  %360 = vmatpush1.xpose.msra.mxu1 %v65_v33 }
  0x2e   :  { %324 = vmatmul.mubr.f32.vlgmr.msra.gmra.mxu0 %v101_v22  ;;  %394 = vmatmul.mubr.f32.vlgmr.msra.gmra.mxu1 %v108_v29 }
  0xe6   :  { %v185_v35 = vpop.f32.mrf.mxu0  ;;  %v255_v36 = vpop.f32.mrf.mxu1 }
  0xe7   :  { %v256_v39 = vadd.f32 %v255_v36, %v185_v35 }
  0xe8   :  { %v187_v37 = vpop.f32.mrf.mxu0  ;;  %v257_v38 = vpop.f32.mrf.mxu1 }
  0xee   :  { %v325_v40 = vpop.f32.mrf.mxu0  ;;  %v395_v42 = vpop.f32.mrf.mxu1 }
  0xef   :  { %v326_v41 = vadd.f32 %v325_v40, %v256_v39 }
  0xf0   :  { %v327_v44 = vpop.f32.mrf.mxu0  ;;  %v397_v46 = vpop.f32.mrf.mxu1 }
  0xf1   :  { %v396_v45 = vadd.f32 %v395_v42, %v326_v41 }
  0xf3   :  { %v399_v47 = vadd.f32 %v396_v45, %v56_v43 }
  0xf5   :  { %401 = vst.msk [vmem:[#allocation7] sm:$0x3] %vm54_vm0, %v399_v47 }
  0xf6   :  { %478 = shalt.err (!%p475_p0)
}
  0xf7   :  { %411 = dma.vmem_to_hbm [thread:$0]  %s409_s1, 32, %s528_s2, [#allocation4]  }
  0xf8   :  { %491 = dma.done.wait [#allocation4], 32  }
  0xf9   :  { %492 = vsyncadd [#allocation4], 4294967264 }
  0xfa   :  { %415 = vsyncpa [#allocation3], 1 }
  0xfb   :  { %416 = vsyncpa [#allocation6], 1 }
  0xfc   :  { %417 = vsyncpa [#allocation4], 1 }

</bundles_post_ra>
